<compile_context>
chip_gen: v7x
topology: tpu7x:2x2x1
jax: 0.10.0
libtpu: 0.0.40
codegen_flags: <defaults>
</compile_context>

<pallas_src>
import numpy as np
import jax
import jax.numpy as jnp
from jax import lax
from jax.experimental import pallas as pl
from jax.experimental.pallas import tpu as pltpu


def _round_up(x, m):
    return ((x + m - 1) // m) * m


def _layer_geometry(H, W, kernel_sizes, paddings):
    """Static per-layer spatial geometry (stride 1, dilation 1)."""
    meta = []
    h, w = H, W
    for k, p in zip(kernel_sizes, paddings):
        k, p = int(k), int(p)
        hp, wp = h + 2 * p, w + 2 * p
        ho, wo = hp - k + 1, wp - k + 1
        meta.append(dict(k=k, p=p, Hin=h, Win=w, Hp=hp, Wp=wp, Ho=ho, Wo=wo))
        h, w = ho, wo
    return meta


def _vmem_bytes(shape, dtype):
    """Rough physical VMEM footprint of a buffer (lane/sublane padded)."""
    itemsize = jnp.dtype(dtype).itemsize
    dims = [int(d) for d in shape]
    if len(dims) >= 1:
        dims[-1] = _round_up(dims[-1], 128)
    if len(dims) >= 2:
        dims[-2] = _round_up(dims[-2], 8 * max(1, 4 // itemsize))
    n = 1
    for d in dims:
        n *= d
    return n * itemsize


def _pack_layer(wgt, bias, m, Ci, Co, wcp_in, last, p_next, ncolp):
    """Build the banded (lane-flattened) weight matrix + bias row for a layer.

    The kw taps and (for intermediate layers) the next layer's W zero-padding
    are folded into the columns, so a conv layer becomes K row-shifted
    matmuls:  OUT = sum_kh  A[kh:kh+Ho, :] @ B[kh]  with
      A[h, w*Ci + ci]                      = padded input
      intermediate:  col = (wo + p_next)*Co + co   (next layer's layout)
      last layer:    col = co*Wo + wo              (NCHW-friendly layout)
    """
    K, Wo = int(m["k"]), int(m["Wo"])
    wnp = np.asarray(wgt, np.float32)          # (K, K, Ci, Co)  HWIO
    bnp = np.asarray(bias, np.float32)         # (Co,)
    B = np.zeros((K, wcp_in, ncolp), np.float32)
    brow = np.zeros((1, ncolp), np.float32)
    for kh in range(K):
        for kw in range(K):
            blk = wnp[kh, kw]                  # (Ci, Co)
            for wo in range(Wo):
                r0 = (wo + kw) * Ci
                if last:
                    # strided columns co*Wo + wo, co = 0..Co-1
                    B[kh, r0:r0 + Ci, wo:wo + Co * Wo:Wo] = blk
                else:
                    c0 = (wo + p_next) * Co
                    B[kh, r0:r0 + Ci, c0:c0 + Co] = blk
    if last:
        brow[0, :Co * Wo] = np.repeat(bnp, Wo)
    else:
        # zero on the W-padding columns so they stay 0 after bias + ReLU
        brow[0, p_next * Co:(p_next + Wo) * Co] = np.tile(bnp, Wo)
    return jnp.asarray(B, dtype=jnp.bfloat16), jnp.asarray(brow, dtype=jnp.float32)


def _build_fused_kernel(meta, chans, wcp, activation_last):
    """Kernel body: full conv stack for one batch element."""
    L = len(meta)
    Cout = chans[-1]

    def kernel(*refs):
        # refs = x, (B0, b0, B1, b1, ...), out, scratch...
        x_ref = refs[0]
        w_refs = [refs[1 + 2 * l] for l in range(L)]
        b_refs = [refs[2 + 2 * l] for l in range(L)]
        o_ref = refs[1 + 2 * L]
        scratch = list(refs[2 + 2 * L:])       # L-1 intermediate activation bufs

        # Zero ONLY the top/bottom H-halo rows of each intermediate buffer
        # (~2*p rows instead of the whole buffer).  The interior rows and the
        # W-halo lanes are fully rewritten below every grid step (the W
        # padding is folded into the banded weights as zero columns).  Done
        # per step (not @pl.when(first)) so it stays correct when the
        # "parallel" batch axis is split across TensorCores.
        for l in range(L - 1):
            m_next = meta[l + 1]
            p = m_next["p"]
            if p > 0:
                z = jnp.zeros((p, wcp[l + 1]), jnp.bfloat16)
                scratch[l][0:p, :] = z
                scratch[l][m_next["Hp"] - p:m_next["Hp"], :] = z

        for l in range(L):
            m = meta[l]
            K, Ho, Wo = m["k"], m["Ho"], m["Wo"]

            # Conv layer = K banded matmuls; f32 accumulator is only a few
            # vregs ((Ho, ncol)), so functional accumulation stays in regs.
            acc = None
            for kh in range(K):
                if l == 0:
                    a = x_ref[0, kh:kh + Ho, :]
                else:
                    a = scratch[l - 1][kh:kh + Ho, :]
                part = jnp.dot(a, w_refs[l][kh],
                               preferred_element_type=jnp.float32)
                acc = part if acc is None else acc + part
            acc = acc + b_refs[l][...]
            if (l < L - 1) or activation_last:
                acc = jnp.maximum(acc, 0.0)

            if l < L - 1:
                # Store the next layer's (W-padded, flattened) rows in bf16.
                p_next = meta[l + 1]["p"]
                scratch[l][p_next:p_next + Ho, :] = acc.astype(jnp.bfloat16)
            else:
                # Write NCHW directly: with the last layer's column order
                # (co, wo), channel co is the contiguous lane slice
                # [co*Wo, (co+1)*Wo).  No wrapper-side slice / transpose.
                for co in range(Cout):
                    o_ref[0, co, :, :] = (
                        acc[:, co * Wo:(co + 1) * Wo].astype(o_ref.dtype))

    return kernel


def shortcut_conv2d(x_nchw, weights, biases, paddings, activation_last=False):
    """ShortcutConv2d.forward.  x_nchw: (N,C,H,W); weights: HWIO per layer.

    Only plain nn.Conv2d(inc, outc, k, padding=p) layers are supported
    (stride=1, dilation=1, groups=1) -- which is all ShortcutConv2d builds.
    """
    L = len(weights)
    assert L >= 1 and L == len(biases) == len(paddings)
    N, Cin, H, W = (int(s) for s in x_nchw.shape)
    chans = [Cin] + [int(w.shape[-1]) for w in weights]
    for i, w in enumerate(weights):
        assert w.ndim == 4 and int(w.shape[0]) == int(w.shape[1]), \
            "square HWIO kernels expected"
        assert int(w.shape[2]) == chans[i], "in-channel mismatch"
        assert int(biases[i].shape[0]) == chans[i + 1], "bias shape mismatch"
    Cout = chans[-1]
    kernel_sizes = tuple(int(w.shape[0]) for w in weights)
    meta = _layer_geometry(H, W, kernel_sizes, paddings)

    # Lane-padded flattened widths: layer l consumes rows of width Wp_l*Ci_l,
    # rounded up to a multiple of 128 so every matmul operand / VMEM buffer /
    # DMA is lane-dense (no padding of tiny channel counts up to 128).
    wcp = [_round_up(meta[l]["Wp"] * chans[l], 128) for l in range(L)]
    ncolp = ([wcp[l + 1] for l in range(L - 1)]
             + [_round_up(Cout * meta[-1]["Wo"], 128)])

    # Input: NCHW -> (N, Hp0, Wp0*Cin) flattened rows, bf16, spatial halo for
    # layer 0 only.  No 32x channel-padding HBM amplification.
    p0 = meta[0]["p"]
    x = jnp.transpose(x_nchw, (0, 2, 3, 1))
    x = jnp.pad(x, ((0, 0), (p0, p0), (p0, p0), (0, 0)))
    x = x.reshape(N, meta[0]["Hp"], meta[0]["Wp"] * Cin)
    x = jnp.pad(x, ((0, 0), (0, 0), (0, wcp[0] - meta[0]["Wp"] * Cin)))
    x = x.astype(jnp.bfloat16)

    # Banded bf16 weights (kw taps + next layer's W-halo folded in) + f32 bias rows.
    packed_w, packed_b = [], []
    for l in range(L):
        last = (l == L - 1)
        p_next = 0 if last else meta[l + 1]["p"]
        Bm, br = _pack_layer(weights[l], biases[l], meta[l], chans[l],
                             chans[l + 1], wcp[l], last, p_next, ncolp[l])
        packed_w.append(Bm)
        packed_b.append(br)

    mL = meta[-1]
    Ho, Wo = mL["Ho"], mL["Wo"]

    in_specs = [pl.BlockSpec((1, meta[0]["Hp"], wcp[0]), lambda n: (n, 0, 0))]
    args = [x]
    for Bm, br in zip(packed_w, packed_b):
        in_specs.append(pl.BlockSpec(Bm.shape, lambda n: (0, 0, 0)))
        in_specs.append(pl.BlockSpec(br.shape, lambda n: (0, 0)))
        args.extend([Bm, br])

    # Intermediate activations: bf16 VMEM scratch (halo included).
    scratch_shapes = [pltpu.VMEM((meta[l]["Hp"], wcp[l]), jnp.bfloat16)
                      for l in range(1, L)]

    # Scoped-VMEM budget from the actual block + scratch footprint.
    vmem_est = 2 * _vmem_bytes((1, meta[0]["Hp"], wcp[0]), jnp.bfloat16)
    vmem_est += 2 * _vmem_bytes((1, Cout, Ho, Wo), x_nchw.dtype)
    for Bm, br in zip(packed_w, packed_b):
        vmem_est += 2 * _vmem_bytes(Bm.shape, Bm.dtype)
        vmem_est += 2 * _vmem_bytes(br.shape, br.dtype)
    for l in range(1, L):
        vmem_est += _vmem_bytes((meta[l]["Hp"], wcp[l]), jnp.bfloat16)
    vmem_limit = int(min(max(4 * vmem_est, 32 * 1024 * 1024),
                         100 * 1024 * 1024))

    out = pl.pallas_call(
        _build_fused_kernel(meta, chans, wcp, activation_last),
        out_shape=jax.ShapeDtypeStruct((N, Cout, Ho, Wo), x_nchw.dtype),
        grid=(N,),
        in_specs=in_specs,
        out_specs=pl.BlockSpec((1, Cout, Ho, Wo), lambda n: (n, 0, 0, 0)),
        scratch_shapes=scratch_shapes,
        compiler_params=pltpu.CompilerParams(
            dimension_semantics=("parallel",),
            vmem_limit_bytes=vmem_limit),
    )(*args)
    return out                                   # already NCHW, exact channels


def _reference(x_nchw, weights, biases, paddings, activation_last=False):
    """Pure-JAX reference with the same bf16 quantization points as the kernel."""
    L = len(weights)
    x = jnp.transpose(x_nchw, (0, 2, 3, 1)).astype(jnp.float32)
    for i, (w, b, p) in enumerate(zip(weights, biases, paddings)):
        y = lax.conv_general_dilated(
            x.astype(jnp.bfloat16), w.astype(jnp.bfloat16),
            window_strides=(1, 1), padding=[(p, p), (p, p)],
            dimension_numbers=("NHWC", "HWIO", "NHWC"),
            preferred_element_type=jnp.float32,
        ) + b[None, None, None, :]
        if (i < L - 1) or activation_last:
            y = jnp.maximum(y, 0.0)
        x = y
    return jnp.transpose(x, (0, 3, 1, 2))


if __name__ == "__main__":
    # Module config: two 3x3 convs, ReLU in between, no activation on the last.
    in_channels, out_channels = 4, 8
    kernel_sizes = (3, 3)
    paddings = (1, 1)
    activation_last = False

    # Deterministic synthetic parameters (HWIO layout).
    key = jax.random.PRNGKey(0)
    weights, biases = [], []
    for i, k in enumerate(kernel_sizes):
        inc = in_channels if i == 0 else out_channels
        key, kw_key, kb_key = jax.random.split(key, 3)
        fan_in = inc * k * k
        w = jax.random.normal(kw_key, (k, k, inc, out_channels), jnp.float32)
        w = w * (1.0 / jnp.sqrt(fan_in))
        b = jax.random.normal(kb_key, (out_channels,), jnp.float32) * 0.01
        weights.append(w)
        biases.append(b)

    # Example input, NCHW like PyTorch.
    key, kx = jax.random.split(key)
    x = jax.random.normal(kx, (2, in_channels, 16, 16), jnp.float32)

    y = shortcut_conv2d(x, weights, biases, paddings, activation_last)
    y = jax.block_until_ready(y)

    y_ref = _reference(x, weights, biases, paddings, activation_last)
    assert y.shape == (2, out_channels, 16, 16)
    assert jnp.allclose(y, y_ref, atol=1e-2, rtol=1e-2), (
        float(jnp.max(jnp.abs(y - y_ref))))

    print("KERNEL_OK")
</pallas_src>

<mosaic_0001>
module attributes {stable_mosaic.version = 11 : i64} {
  func.func @kernel(%arg0: i32, %arg1: memref<1x18x128xbf16, #tpu.memory_space<vmem>>, %arg2: memref<3x128x256xbf16, #tpu.memory_space<vmem>>, %arg3: memref<1x256xf32, #tpu.memory_space<vmem>>, %arg4: memref<3x256x128xbf16, #tpu.memory_space<vmem>>, %arg5: memref<1x128xf32, #tpu.memory_space<vmem>>, %arg6: memref<1x8x16x16xf32, #tpu.memory_space<vmem>>, %arg7: memref<18x256xbf16, #tpu.memory_space<vmem>>) attributes {dimension_semantics = [#tpu.dimension_semantics<parallel>], iteration_bounds = array<i64: 2>, scalar_prefetch = 0 : i64, scratch_operands = 1 : i64, tpu.core_type = #tpu.core_type<tc>, window_params = [{transform_indices = @transform_0, window_bounds = array<i64: 1, 18, 128>}, {pipeline_mode = #tpu.pipeline_mode<synchronous>, transform_indices = @transform_1, window_bounds = array<i64: 3, 128, 256>}, {pipeline_mode = #tpu.pipeline_mode<synchronous>, transform_indices = @transform_2, window_bounds = array<i64: 1, 256>}, {pipeline_mode = #tpu.pipeline_mode<synchronous>, transform_indices = @transform_3, window_bounds = array<i64: 3, 256, 128>}, {pipeline_mode = #tpu.pipeline_mode<synchronous>, transform_indices = @transform_4, window_bounds = array<i64: 1, 128>}, {transform_indices = @transform_5, window_bounds = array<i64: 1, 8, 16, 16>}]} {
    %cst = arith.constant 0.000000e+00 : bf16
    %0 = vector.broadcast %cst : bf16 to vector<1x256xbf16>
    %c0 = arith.constant 0 : index
    %c0_0 = arith.constant 0 : index
    %1 = vector.load %arg7[%c0, %c0_0] : memref<18x256xbf16, #tpu.memory_space<vmem>>, vector<1x256xbf16>
    tpu.vector_store %arg7[%c0, %c0_0], %0 {strides = array<i32>} : memref<18x256xbf16, #tpu.memory_space<vmem>>, vector<1x256xbf16>,
    %c17 = arith.constant 17 : index
    %c0_1 = arith.constant 0 : index
    %2 = vector.load %arg7[%c17, %c0_1] : memref<18x256xbf16, #tpu.memory_space<vmem>>, vector<1x256xbf16>
    tpu.vector_store %arg7[%c17, %c0_1], %0 {strides = array<i32>} : memref<18x256xbf16, #tpu.memory_space<vmem>>, vector<1x256xbf16>,
    %c0_2 = arith.constant 0 : index
    %c0_3 = arith.constant 0 : index
    %c0_4 = arith.constant 0 : index
    %3 = vector.load %arg1[%c0_2, %c0_3, %c0_4] : memref<1x18x128xbf16, #tpu.memory_space<vmem>>, vector<1x16x128xbf16>
    %4 = vector.shape_cast %3 : vector<1x16x128xbf16> to vector<16x128xbf16>
    %c0_5 = arith.constant 0 : index
    %c0_6 = arith.constant 0 : index
    %c0_7 = arith.constant 0 : index
    %5 = vector.load %arg2[%c0_5, %c0_6, %c0_7] : memref<3x128x256xbf16, #tpu.memory_space<vmem>>, vector<1x128x256xbf16>
    %6 = vector.shape_cast %5 : vector<1x128x256xbf16> to vector<128x256xbf16>
    %cst_8 = arith.constant dense<0.000000e+00> : vector<16x256xf32>
    %7 = tpu.matmul %4, %6, %cst_8 {dimension_numbers = #tpu.dot_dimension_numbers<[1], [0], [0], [1], [0, 0, 1, 1], [], []>} : vector<16x128xbf16>, vector<128x256xbf16>, vector<16x256xf32> -> vector<16x256xf32>
    %c0_9 = arith.constant 0 : index
    %c1 = arith.constant 1 : index
    %c0_10 = arith.constant 0 : index
    %8 = vector.load %arg1[%c0_9, %c1, %c0_10] : memref<1x18x128xbf16, #tpu.memory_space<vmem>>, vector<1x16x128xbf16>
    %9 = vector.shape_cast %8 : vector<1x16x128xbf16> to vector<16x128xbf16>
    %c1_11 = arith.constant 1 : index
    %c0_12 = arith.constant 0 : index
    %c0_13 = arith.constant 0 : index
    %10 = vector.load %arg2[%c1_11, %c0_12, %c0_13] : memref<3x128x256xbf16, #tpu.memory_space<vmem>>, vector<1x128x256xbf16>
    %11 = vector.shape_cast %10 : vector<1x128x256xbf16> to vector<128x256xbf16>
    %cst_14 = arith.constant dense<0.000000e+00> : vector<16x256xf32>
    %12 = tpu.matmul %9, %11, %cst_14 {dimension_numbers = #tpu.dot_dimension_numbers<[1], [0], [0], [1], [0, 0, 1, 1], [], []>} : vector<16x128xbf16>, vector<128x256xbf16>, vector<16x256xf32> -> vector<16x256xf32>
    %13 = arith.addf %7, %12 : vector<16x256xf32>
    %c0_15 = arith.constant 0 : index
    %c2 = arith.constant 2 : index
    %c0_16 = arith.constant 0 : index
    %14 = vector.load %arg1[%c0_15, %c2, %c0_16] : memref<1x18x128xbf16, #tpu.memory_space<vmem>>, vector<1x16x128xbf16>
    %15 = vector.shape_cast %14 : vector<1x16x128xbf16> to vector<16x128xbf16>
    %c2_17 = arith.constant 2 : index
    %c0_18 = arith.constant 0 : index
    %c0_19 = arith.constant 0 : index
    %16 = vector.load %arg2[%c2_17, %c0_18, %c0_19] : memref<3x128x256xbf16, #tpu.memory_space<vmem>>, vector<1x128x256xbf16>
    %17 = vector.shape_cast %16 : vector<1x128x256xbf16> to vector<128x256xbf16>
    %cst_20 = arith.constant dense<0.000000e+00> : vector<16x256xf32>
    %18 = tpu.matmul %15, %17, %cst_20 {dimension_numbers = #tpu.dot_dimension_numbers<[1], [0], [0], [1], [0, 0, 1, 1], [], []>} : vector<16x128xbf16>, vector<128x256xbf16>, vector<16x256xf32> -> vector<16x256xf32>
    %19 = arith.addf %13, %18 : vector<16x256xf32>
    %c0_21 = arith.constant 0 : index
    %c0_22 = arith.constant 0 : index
    %20 = vector.load %arg3[%c0_21, %c0_22] : memref<1x256xf32, #tpu.memory_space<vmem>>, vector<1x256xf32>
    %21 = vector.broadcast %20 : vector<1x256xf32> to vector<16x256xf32>
    %22 = arith.addf %19, %21 : vector<16x256xf32>
    %cst_23 = arith.constant 0.000000e+00 : f32
    %23 = vector.broadcast %cst_23 : f32 to vector<16x256xf32>
    %24 = arith.maximumf %22, %23 : vector<16x256xf32>
    %25 = arith.truncf %24 : vector<16x256xf32> to vector<16x256xbf16>
    %c1_24 = arith.constant 1 : index
    %c0_25 = arith.constant 0 : index
    %26 = vector.load %arg7[%c1_24, %c0_25] : memref<18x256xbf16, #tpu.memory_space<vmem>>, vector<16x256xbf16>
    tpu.vector_store %arg7[%c1_24, %c0_25], %25 {strides = array<i32>} : memref<18x256xbf16, #tpu.memory_space<vmem>>, vector<16x256xbf16>,
    %c0_26 = arith.constant 0 : index
    %c0_27 = arith.constant 0 : index
    %27 = vector.load %arg7[%c0_26, %c0_27] : memref<18x256xbf16, #tpu.memory_space<vmem>>, vector<16x256xbf16>
    %c0_28 = arith.constant 0 : index
    %c0_29 = arith.constant 0 : index
    %c0_30 = arith.constant 0 : index
    %28 = vector.load %arg4[%c0_28, %c0_29, %c0_30] : memref<3x256x128xbf16, #tpu.memory_space<vmem>>, vector<1x256x128xbf16>
    %29 = vector.shape_cast %28 : vector<1x256x128xbf16> to vector<256x128xbf16>
    %cst_31 = arith.constant dense<0.000000e+00> : vector<16x128xf32>
    %30 = tpu.matmul %27, %29, %cst_31 {dimension_numbers = #tpu.dot_dimension_numbers<[1], [0], [0], [1], [0, 0, 1, 1], [], []>} : vector<16x256xbf16>, vector<256x128xbf16>, vector<16x128xf32> -> vector<16x128xf32>
    %c1_32 = arith.constant 1 : index
    %c0_33 = arith.constant 0 : index
    %31 = vector.load %arg7[%c1_32, %c0_33] : memref<18x256xbf16, #tpu.memory_space<vmem>>, vector<16x256xbf16>
    %c1_34 = arith.constant 1 : index
    %c0_35 = arith.constant 0 : index
    %c0_36 = arith.constant 0 : index
    %32 = vector.load %arg4[%c1_34, %c0_35, %c0_36] : memref<3x256x128xbf16, #tpu.memory_space<vmem>>, vector<1x256x128xbf16>
    %33 = vector.shape_cast %32 : vector<1x256x128xbf16> to vector<256x128xbf16>
    %cst_37 = arith.constant dense<0.000000e+00> : vector<16x128xf32>
    %34 = tpu.matmul %31, %33, %cst_37 {dimension_numbers = #tpu.dot_dimension_numbers<[1], [0], [0], [1], [0, 0, 1, 1], [], []>} : vector<16x256xbf16>, vector<256x128xbf16>, vector<16x128xf32> -> vector<16x128xf32>
    %35 = arith.addf %30, %34 : vector<16x128xf32>
    %c2_38 = arith.constant 2 : index
    %c0_39 = arith.constant 0 : index
    %36 = vector.load %arg7[%c2_38, %c0_39] : memref<18x256xbf16, #tpu.memory_space<vmem>>, vector<16x256xbf16>
    %c2_40 = arith.constant 2 : index
    %c0_41 = arith.constant 0 : index
    %c0_42 = arith.constant 0 : index
    %37 = vector.load %arg4[%c2_40, %c0_41, %c0_42] : memref<3x256x128xbf16, #tpu.memory_space<vmem>>, vector<1x256x128xbf16>
    %38 = vector.shape_cast %37 : vector<1x256x128xbf16> to vector<256x128xbf16>
    %cst_43 = arith.constant dense<0.000000e+00> : vector<16x128xf32>
    %39 = tpu.matmul %36, %38, %cst_43 {dimension_numbers = #tpu.dot_dimension_numbers<[1], [0], [0], [1], [0, 0, 1, 1], [], []>} : vector<16x256xbf16>, vector<256x128xbf16>, vector<16x128xf32> -> vector<16x128xf32>
    %40 = arith.addf %35, %39 : vector<16x128xf32>
    %c0_44 = arith.constant 0 : index
    %c0_45 = arith.constant 0 : index
    %41 = vector.load %arg5[%c0_44, %c0_45] : memref<1x128xf32, #tpu.memory_space<vmem>>, vector<1x128xf32>
    %42 = vector.broadcast %41 : vector<1x128xf32> to vector<16x128xf32>
    %43 = arith.addf %40, %42 : vector<16x128xf32>
    %44 = vector.extract_strided_slice %43 {offsets = [0, 0], sizes = [16, 16], strides = [1, 1]} : vector<16x128xf32> to vector<16x16xf32>
    %c0_46 = arith.constant 0 : index
    %c0_47 = arith.constant 0 : index
    %c0_48 = arith.constant 0 : index
    %c0_49 = arith.constant 0 : index
    %45 = vector.load %arg6[%c0_46, %c0_47, %c0_48, %c0_49] : memref<1x8x16x16xf32, #tpu.memory_space<vmem>>, vector<1x1x16x16xf32>
    %46 = vector.shape_cast %45 : vector<1x1x16x16xf32> to vector<16x16xf32>
    %47 = vector.shape_cast %44 : vector<16x16xf32> to vector<1x1x16x16xf32>
    tpu.vector_store %arg6[%c0_46, %c0_47, %c0_48, %c0_49], %47 {strides = array<i32>} : memref<1x8x16x16xf32, #tpu.memory_space<vmem>>, vector<1x1x16x16xf32>,
    %48 = vector.extract_strided_slice %43 {offsets = [0, 16], sizes = [16, 16], strides = [1, 1]} : vector<16x128xf32> to vector<16x16xf32>
    %c0_50 = arith.constant 0 : index
    %c1_51 = arith.constant 1 : index
    %c0_52 = arith.constant 0 : index
    %c0_53 = arith.constant 0 : index
    %49 = vector.load %arg6[%c0_50, %c1_51, %c0_52, %c0_53] : memref<1x8x16x16xf32, #tpu.memory_space<vmem>>, vector<1x1x16x16xf32>
    %50 = vector.shape_cast %49 : vector<1x1x16x16xf32> to vector<16x16xf32>
    %51 = vector.shape_cast %48 : vector<16x16xf32> to vector<1x1x16x16xf32>
    tpu.vector_store %arg6[%c0_50, %c1_51, %c0_52, %c0_53], %51 {strides = array<i32>} : memref<1x8x16x16xf32, #tpu.memory_space<vmem>>, vector<1x1x16x16xf32>,
    %52 = vector.extract_strided_slice %43 {offsets = [0, 32], sizes = [16, 16], strides = [1, 1]} : vector<16x128xf32> to vector<16x16xf32>
    %c0_54 = arith.constant 0 : index
    %c2_55 = arith.constant 2 : index
    %c0_56 = arith.constant 0 : index
    %c0_57 = arith.constant 0 : index
    %53 = vector.load %arg6[%c0_54, %c2_55, %c0_56, %c0_57] : memref<1x8x16x16xf32, #tpu.memory_space<vmem>>, vector<1x1x16x16xf32>
    %54 = vector.shape_cast %53 : vector<1x1x16x16xf32> to vector<16x16xf32>
    %55 = vector.shape_cast %52 : vector<16x16xf32> to vector<1x1x16x16xf32>
    tpu.vector_store %arg6[%c0_54, %c2_55, %c0_56, %c0_57], %55 {strides = array<i32>} : memref<1x8x16x16xf32, #tpu.memory_space<vmem>>, vector<1x1x16x16xf32>,
    %56 = vector.extract_strided_slice %43 {offsets = [0, 48], sizes = [16, 16], strides = [1, 1]} : vector<16x128xf32> to vector<16x16xf32>
    %c0_58 = arith.constant 0 : index
    %c3 = arith.constant 3 : index
    %c0_59 = arith.constant 0 : index
    %c0_60 = arith.constant 0 : index
    %57 = vector.load %arg6[%c0_58, %c3, %c0_59, %c0_60] : memref<1x8x16x16xf32, #tpu.memory_space<vmem>>, vector<1x1x16x16xf32>
    %58 = vector.shape_cast %57 : vector<1x1x16x16xf32> to vector<16x16xf32>
    %59 = vector.shape_cast %56 : vector<16x16xf32> to vector<1x1x16x16xf32>
    tpu.vector_store %arg6[%c0_58, %c3, %c0_59, %c0_60], %59 {strides = array<i32>} : memref<1x8x16x16xf32, #tpu.memory_space<vmem>>, vector<1x1x16x16xf32>,
    %60 = vector.extract_strided_slice %43 {offsets = [0, 64], sizes = [16, 16], strides = [1, 1]} : vector<16x128xf32> to vector<16x16xf32>
    %c0_61 = arith.constant 0 : index
    %c4 = arith.constant 4 : index
    %c0_62 = arith.constant 0 : index
    %c0_63 = arith.constant 0 : index
    %61 = vector.load %arg6[%c0_61, %c4, %c0_62, %c0_63] : memref<1x8x16x16xf32, #tpu.memory_space<vmem>>, vector<1x1x16x16xf32>
    %62 = vector.shape_cast %61 : vector<1x1x16x16xf32> to vector<16x16xf32>
    %63 = vector.shape_cast %60 : vector<16x16xf32> to vector<1x1x16x16xf32>
    tpu.vector_store %arg6[%c0_61, %c4, %c0_62, %c0_63], %63 {strides = array<i32>} : memref<1x8x16x16xf32, #tpu.memory_space<vmem>>, vector<1x1x16x16xf32>,
    %64 = vector.extract_strided_slice %43 {offsets = [0, 80], sizes = [16, 16], strides = [1, 1]} : vector<16x128xf32> to vector<16x16xf32>
    %c0_64 = arith.constant 0 : index
    %c5 = arith.constant 5 : index
    %c0_65 = arith.constant 0 : index
    %c0_66 = arith.constant 0 : index
    %65 = vector.load %arg6[%c0_64, %c5, %c0_65, %c0_66] : memref<1x8x16x16xf32, #tpu.memory_space<vmem>>, vector<1x1x16x16xf32>
    %66 = vector.shape_cast %65 : vector<1x1x16x16xf32> to vector<16x16xf32>
    %67 = vector.shape_cast %64 : vector<16x16xf32> to vector<1x1x16x16xf32>
    tpu.vector_store %arg6[%c0_64, %c5, %c0_65, %c0_66], %67 {strides = array<i32>} : memref<1x8x16x16xf32, #tpu.memory_space<vmem>>, vector<1x1x16x16xf32>,
    %68 = vector.extract_strided_slice %43 {offsets = [0, 96], sizes = [16, 16], strides = [1, 1]} : vector<16x128xf32> to vector<16x16xf32>
    %c0_67 = arith.constant 0 : index
    %c6 = arith.constant 6 : index
    %c0_68 = arith.constant 0 : index
    %c0_69 = arith.constant 0 : index
    %69 = vector.load %arg6[%c0_67, %c6, %c0_68, %c0_69] : memref<1x8x16x16xf32, #tpu.memory_space<vmem>>, vector<1x1x16x16xf32>
    %70 = vector.shape_cast %69 : vector<1x1x16x16xf32> to vector<16x16xf32>
    %71 = vector.shape_cast %68 : vector<16x16xf32> to vector<1x1x16x16xf32>
    tpu.vector_store %arg6[%c0_67, %c6, %c0_68, %c0_69], %71 {strides = array<i32>} : memref<1x8x16x16xf32, #tpu.memory_space<vmem>>, vector<1x1x16x16xf32>,
    %72 = vector.extract_strided_slice %43 {offsets = [0, 112], sizes = [16, 16], strides = [1, 1]} : vector<16x128xf32> to vector<16x16xf32>
    %c0_70 = arith.constant 0 : index
    %c7 = arith.constant 7 : index
    %c0_71 = arith.constant 0 : index
    %c0_72 = arith.constant 0 : index
    %73 = vector.load %arg6[%c0_70, %c7, %c0_71, %c0_72] : memref<1x8x16x16xf32, #tpu.memory_space<vmem>>, vector<1x1x16x16xf32>
    %74 = vector.shape_cast %73 : vector<1x1x16x16xf32> to vector<16x16xf32>
    %75 = vector.shape_cast %72 : vector<16x16xf32> to vector<1x1x16x16xf32>
    tpu.vector_store %arg6[%c0_70, %c7, %c0_71, %c0_72], %75 {strides = array<i32>} : memref<1x8x16x16xf32, #tpu.memory_space<vmem>>, vector<1x1x16x16xf32>,
    return
  }
  func.func @transform_0(%arg0: i32) -> (i32, i32, i32) {
    %c0_i32 = arith.constant 0 : i32
    %c0_i32_0 = arith.constant 0 : i32
    %c0_i32_1 = arith.constant 0 : i32
    return %arg0, %c0_i32, %c0_i32_0 : i32, i32, i32
  }
  func.func @transform_1(%arg0: i32) -> (i32, i32, i32) {
    %c0_i32 = arith.constant 0 : i32
    %c0_i32_0 = arith.constant 0 : i32
    %c0_i32_1 = arith.constant 0 : i32
    %c0_i32_2 = arith.constant 0 : i32
    return %c0_i32, %c0_i32_0, %c0_i32_1 : i32, i32, i32
  }
  func.func @transform_2(%arg0: i32) -> (i32, i32) {
    %c0_i32 = arith.constant 0 : i32
    %c0_i32_0 = arith.constant 0 : i32
    %c0_i32_1 = arith.constant 0 : i32
    return %c0_i32, %c0_i32_0 : i32, i32
  }
  func.func @transform_3(%arg0: i32) -> (i32, i32, i32) {
    %c0_i32 = arith.constant 0 : i32
    %c0_i32_0 = arith.constant 0 : i32
    %c0_i32_1 = arith.constant 0 : i32
    %c0_i32_2 = arith.constant 0 : i32
    return %c0_i32, %c0_i32_0, %c0_i32_1 : i32, i32, i32
  }
  func.func @transform_4(%arg0: i32) -> (i32, i32) {
    %c0_i32 = arith.constant 0 : i32
    %c0_i32_0 = arith.constant 0 : i32
    %c0_i32_1 = arith.constant 0 : i32
    return %c0_i32, %c0_i32_0 : i32, i32
  }
  func.func @transform_5(%arg0: i32) -> (i32, i32, i32, i32) {
    %c0_i32 = arith.constant 0 : i32
    %c0_i32_0 = arith.constant 0 : i32
    %c0_i32_1 = arith.constant 0 : i32
    %c0_i32_2 = arith.constant 0 : i32
    return %arg0, %c0_i32, %c0_i32_0, %c0_i32_1 : i32, i32, i32, i32
  }
}

</mosaic_0001>

<bundles_post_ra>
// kernel: tpu_custom_call.1
= control target key start
LH: loop header
LB: loop body
LE: loop exit
PB: predicated region body
PF: predicated region fallthrough
CT: control target
= control target key end

     0   :  { %10 = vsyncpa [#allocation4], 0  ;;  %s2423_s0 = inlined_call_operand.vmem [shape: bf16[2,18,128], index: 0, kind: input, shape index: {}]   ;;  %s2424_s1 = inlined_call_operand.hbm [shape: bf16[3,128,256], index: 1, kind: input, shape index: {}]   ;;  %s2425_s2 = inlined_call_operand.vmem [shape: f32[1,256], index: 2, kind: input, shape index: {}]   ;;  %s2426_s3 = inlined_call_operand.hbm [shape: bf16[3,256,128], index: 3, kind: input, shape index: {}]   ;;  %s2427_s4 = inlined_call_operand.vmem [shape: f32[1,128], index: 4, kind: input, shape index: {}]   ;;  %s2428_s5 = inlined_call_operand.hbm [shape: f32[2,8,16,16], index: 5, kind: output, shape index: {}]  }
   0x1   :  { %11 = vsyncpa [#allocation7], 0 }
   0x2   :  { %12 = vsyncpa [#allocation5], 0 }
   0x3   :  { %14 = vsyncpa [#allocation5 + $0x1], 0  ;;  %s2127_s18 = smov 0   ;;  %s2129_s19 = smov 0  }
   0x4   :  { %s2131_s20 = smov 0   ;;  %s2133_s21 = smov 0  }
   0x5 LB: > { %s2148_s22 = sadd.s32 4294967295, %s2078_s21   ;;  %s1538_s23 = sadd.s32 4294967294, %s2078_s21   ;;  %s2078_s21 = sphi %s2133_s21, %s2454_s21   ;;  %s2074_s20 = sphi %s2131_s20, %s2453_s20   ;;  %s2070_s19 = sphi %s2129_s19, %s2452_s19   ;;  %s2066_s18 = sphi %s2127_s18, %s2451_s18  }
   0x6   : > { %s2152_s24 = sadd.s32 1, %s2078_s21   ;;  %s137_s25 = sadd.s32 1, %s2074_s20 }
   0x7   : > { %s134_s26 = ssub.s32 %s2078_s21, %s2152_s24  ;;  %p147_p0 = scmp.ne.s32.totalorder %s2074_s20, %s2070_s19 }
   0x8   : > { %p135_p1 = scmp.eq.s32.totalorder %s134_s26, 0  ;;  %p148_p2 = scmp.eq.s32.totalorder %s2148_s22, 1 }
   0x9   : > { %p153_p3 = scmp.ne.s32.totalorder %s2070_s19, %s2066_s18  ;;  %p154_p4 = scmp.eq.s32.totalorder %s1538_s23, 1 }
   0xa   : > { %s2163_s27 = scalar_select %p135_p1, %s2074_s20, %s137_s25  }
   0xb   : > { %p2165_p5 = por %p148_p2, %p147_p0  ;;  %p2169_p6 = por %p154_p4, %p153_p3 }
   0xc   : > { %p1539_p7 = scmp.ge.s32.totalorder %s2078_s21, 1  ;;  %p161_p8 = scmp.lt.s32.totalorder %s2078_s21, 3 }
   0xd   : > { %s2432_s28 = scalar_select %p2165_p5, 1, 0 }
   0xe   : > { %s2433_s29 = scalar_select %p2169_p6, 1, 0 }
   0xf   : > { %p2429_p9 = scmp.eq.s32.totalorder %s2148_s22, 0  ;;  %p2176_p10 = pnand %p1539_p7, %p161_p8 }
  0x10   : > { %s2080_s6 = smov [#allocation3]   ;;  %s2081_s9 = smov [#allocation6]  }
  0x11   : > { %s2434_s30 = scalar_select %p2176_p10, 1, 0 }
  0x12   : > { %s173_s7 = sshll.u32 %s2080_s6, 4  ;;  %p1763_p11 = pneg %p2176_p10  ;;  %s174_s7 = int_to_ptr.vmem [resolvable:$true] %s173_s7 }
  0x13   : > { %s189_s10 = sshll.u32 %s2081_s9, 4  ;;  %s1952_s13 = scalar_lea.hbm %s2424_s1, 6144  ;;  %s2188_s10 = int_to_ptr.vmem [resolvable:$true] %s189_s10 }
  0x14   : > { %p2184_p12 = pnand %p2429_p9, %p1763_p11  ;;  %p1953_p13 = scmp.ne.s32.totalorder %s2424_s1, %s1952_s13 }
  0x15   : > { %p1959_p3 = scmp.lt.u32.totalorder %s1952_s13, %s2424_s1 }
  0x16   : > { %p1954_p0 = pneg %p2184_p12 }
  0x18   : > { %p1955_p1 = pnand %p1954_p0, %p1953_p13 }
  0x1a   : > { %p1956_p2 = pneg %p1955_p1 }
  0x1c   : > { %p1961_p4 = pnand %p1959_p3, %p1956_p2 }
  0x1e   : > { %1964 = shalt.err (!%p1961_p4)
}
  0x1f   : > { %s1965_s23 = scalar_lea.vmem %s174_s7, 6144  ;;  %p1973_p9 = scmp.lt.s32.totalorder %s174_s7, %s174_s7 }
  0x20   : > { %p1966_p7 = scmp.ne.s32.totalorder %s174_s7, %s1965_s23  ;;  %p1974_p6 = scmp.lt.s32.totalorder %s1965_s23, %s1965_s23 }
  0x22   : > { %p1968_p8 = pnand %p1966_p7, %p1954_p0  ;;  %p1975_p5 = por %p1974_p6, %p1973_p9 }
  0x24   : > { %p1969_p11 = pneg %p1968_p8 }
  0x26   : > { %p1976_p10 = pnand %p1975_p5, %p1969_p11 }
  0x28   : > { %1979 = shalt.err (!%p1976_p10)
}
  0x29   : > { %s2082_s25 = smov 128   ;;  %s2083_s26 = smov 8  }
  0x2a   : > { %1766 = dma.hbm_to_vmem [thread:$0]  (!%p2184_p12), %s2424_s1, 6144, %s174_s7, [#allocation4], %s2082_s25, %s2082_s25, %s2083_s26  }
  0x2b   : > { %s1980_s13 = scalar_lea.hbm %s2426_s3, 6144 }
  0x2c   : > { %p1981_p13 = scmp.ne.s32.totalorder %s2426_s3, %s1980_s13  ;;  %p1987_p9 = scmp.lt.u32.totalorder %s1980_s13, %s2426_s3 }
  0x2e   : > { %p1983_p5 = pnand %p1981_p13, %p1954_p0 }
  0x30   : > { %p1984_p6 = pneg %p1983_p5 }
  0x32   : > { %p1989_p10 = pnand %p1987_p9, %p1984_p6 }
  0x34   : > { %1992 = shalt.err (!%p1989_p10)
}
  0x35   : > { %s1993_s7 = scalar_lea.vmem %s2188_s10, 6144  ;;  %p2001_p4 = scmp.lt.s32.totalorder %s2188_s10, %s2188_s10 }
  0x36   : > { %p1994_p1 = scmp.ne.s32.totalorder %s2188_s10, %s1993_s7  ;;  %p2002_p7 = scmp.lt.s32.totalorder %s1993_s7, %s1993_s7 }
  0x38   : > { %p1996_p2 = pnand %p1994_p1, %p1954_p0  ;;  %p2003_p8 = por %p2002_p7, %p2001_p4 }
  0x3a   : > { %p1997_p3 = pneg %p1996_p2 }
  0x3c   : > { %p2004_p11 = pnand %p2003_p8, %p1997_p3 }
  0x3e   : > { %2007 = shalt.err (!%p2004_p11)
}
  0x3f   : > { %s2084_s23 = smov 64   ;;  %s2085_s25 = smov 4  }
  0x40   : > { %1769 = dma.hbm_to_vmem [thread:$0]  (!%p2184_p12), %s2426_s3, 6144, %s2188_s10, [#allocation7], %s2084_s23, %s2084_s23, %s2085_s25  }
  0x41   : > { %p2436_p13 = scmp.ne.s32.totalorder %s2434_s30, 0 }
  0x42   : > { %p2437_p0 = scmp.eq.s32.totalorder (!%p2436_p13), %s2148_s22, 0 }
  0x43   : > { %216 = sbr.rel (%p2436_p13) target bundleno = 856 (0x358), region = 40 }
  0x4a   : > { %2053 = dma.done.wait (%p2437_p0), [#allocation4], 6144   ;;  %p2438_p5 = pmov %p2437_p0 }
  0x4b   : > { %p2439_p6 = pmov %p2437_p0 }
  0x4c   : > { %2055 = vsyncadd (%p2438_p5), [#allocation4], 4294961152 }
  0x4d   : > { %2057 = dma.done.wait (%p2439_p6), [#allocation7], 6144   ;;  %p2440_p9 = pmov %p2437_p0 }
  0x4e   : > { %v2086_v0 = vmov 0   ;;  %p248_p12 = scmp.lt.s32.totalorder %s2148_s22, 1  ;;  %v1827_v1 = vld [vmem:[#allocation3 + $0x84] ss:$8 sps:$4 sm:$0xff]   ;;  %v1829_v2 = vld [vmem:[#allocation3 + $0x80] ss:$8 sps:$4 sm:$0xff]  }
  0x4f   : > { %2059 = vsyncadd (%p2440_p9), [#allocation7], 4294961152  ;;  %442 = vmatprep.mubr.bf16.mxu0 %v2086_v0  ;;  %410 = vmatprep.subr.bf16.mxu0 %v1827_v1  ;;  %v1830_v3 = vld [vmem:[#allocation3 + $0x94] ss:$8 sps:$4 sm:$0xff]   ;;  %v1832_v4 = vld [vmem:[#allocation3 + $0x90] ss:$8 sps:$4 sm:$0xff]  }
  0x50   : > { %s249_s30 = scalar_select %p248_p12, %s2148_s22, 1  ;;  %411 = vmatpush1.bf16.msra.mxu0 %v1829_v2  ;;  %v1833_v5 = vld [vmem:[#allocation3 + $0xa4] ss:$8 sps:$4 sm:$0xff]   ;;  %v1835_v6 = vld [vmem:[#allocation3 + $0xa0] ss:$8 sps:$4 sm:$0xff]   ;;  %vm598_vm1 = vcmask 1046528  }
  0x51   : > { %412 = vmatprep.subr.bf16.mxu0 %v1830_v3  ;;  %v1836_v7 = vld [vmem:[#allocation3 + $0xb4] ss:$8 sps:$4 sm:$0xff]   ;;  %v1838_v8 = vld [vmem:[#allocation3 + $0xb0] ss:$8 sps:$4 sm:$0xff]   ;;  %v1839_v9 = vld [vmem:[#allocation3 + $0xc4] ss:$8 sps:$4 sm:$0xff]  }
  0x52   : > { %s1752_s8 = smul.u32 12, %s249_s30  ;;  %v1841_v12 = vld [vmem:[#allocation3 + $0xc0] ss:$8 sps:$4 sm:$0xff]   ;;  %v1842_v14 = vld [vmem:[#allocation3 + $0xd4] ss:$8 sps:$4 sm:$0xff]   ;;  %vm254_vm2 = vcmask 1040384  }
  0x53   : > { %v1844_v15 = vld [vmem:[#allocation3 + $0xd0] ss:$8 sps:$4 sm:$0xff]   ;;  %v1845_v18 = vld [vmem:[#allocation3 + $0xe4] ss:$8 sps:$4 sm:$0xff]   ;;  %v1847_v19 = vld [vmem:[#allocation3 + $0xe0] ss:$8 sps:$4 sm:$0xff]  }
  0x54   : > { %413 = vmatpush1.bf16.msra.mxu0 %v1832_v4  ;;  %s2253_s11 = scalar_lea.vmem %s2423_s0, %s1752_s8  ;;  %v1848_v23 = vld [vmem:[#allocation3 + $0xf4] ss:$8 sps:$4 sm:$0xff]   ;;  %v1850_v24 = vld [vmem:[#allocation3 + $0xf0] ss:$8 sps:$4 sm:$0xff]   ;;  %v1853_v27 = vld [vmem:[#allocation3 + $0x4] ss:$8 sps:$4 sm:$0xff]  }
  0x55   : > { %414 = vmatprep.subr.bf16.mxu0 %v1833_v5  ;;  %v272_v10 = vld [vmem:[%s2253_s11] sm:$0xf]  ;;  %v273_v11 = vld [vmem:[%s2253_s11 + $0x4] sm:$0xf]  ;;  %vm316_vm0 = vsmask.f32 7424 }
  0x56   : > { %v2257_v13 = vcombine.low %v272_v10, %v273_v11  ;;  %v1855_v16 = vld [vmem:[%s2253_s11 + $0x8] ss:$0 sps:$4 sm:$0x11]   ;;  %v1851_v28 = vld [vmem:[#allocation3] ss:$8 sps:$4 sm:$0xff]   ;;  %vm257_vm4 = vcmask 1044484  }
  0x57   : > { %v325_v22 = vshll.u32 %v1855_v16, 16  ;;  %v1858_v30 = vld [vmem:[#allocation3 + $0x14] ss:$8 sps:$4 sm:$0xff]   ;;  %v1856_v31 = vld [vmem:[#allocation3 + $0x10] ss:$8 sps:$4 sm:$0xff]   ;;  %v600_v32 = vrot.slane %v1855_v16, 1 }
  0x58   : > { %415 = vmatpush1.bf16.msra.mxu0 %v1835_v6  ;;  %v320_v17 = vshll.u32 %v2257_v13, 16  ;;  %v318_v20 = vshrl.u32 %v2257_v13, 16  ;;  %v1861_v33 = vld [vmem:[#allocation3 + $0x24] ss:$8 sps:$4 sm:$0xff]   ;;  %v577_v34 = vld [vmem:[%s2253_s11] sm:$0xe] }
  0x59   : > { %416 = vmatprep.subr.bf16.mxu0 %v1836_v7  ;;  %v327_v26 = vrot.slane %v325_v22, 1  ;;  %v1582_v35 = vcombine.low %v577_v34, %v273_v11  ;;  %v1859_v36 = vld [vmem:[#allocation3 + $0x20] ss:$8 sps:$4 sm:$0xff]   ;;  %v1864_v38 = vld [vmem:[#allocation3 + $0x34] ss:$8 sps:$4 sm:$0xff]   ;;  %vm782_vm14 = vcmask 1043456  }
  0x5a   : > { %v322_v21 = vrot.slane %v320_v17, 1  ;;  %v1862_v40 = vld [vmem:[#allocation3 + $0x30] ss:$8 sps:$4 sm:$0xff]   ;;  %v1867_v41 = vld [vmem:[#allocation3 + $0x44] ss:$8 sps:$4 sm:$0xff]   ;;  %vm784_vm15 = vcmask 1047556  }
  0x5b   : > { %v599_v37 = vrot.slane %v1582_v35, 1  ;;  %v1865_v42 = vld [vmem:[#allocation3 + $0x40] ss:$8 sps:$4 sm:$0xff]   ;;  %v1870_v43 = vld [vmem:[#allocation3 + $0x54] ss:$8 sps:$4 sm:$0xff]   ;;  %s245_s14 = sand.u32 1, %s2070_s19  }
  0x5c   : > { %417 = vmatpush1.bf16.msra.mxu0 %v1838_v8  ;;  %v323_v25 = vor.u32 %v322_v21, %v318_v20  ;;  %v1868_v44 = vld [vmem:[#allocation3 + $0x50] ss:$8 sps:$4 sm:$0xff]   ;;  %v1873_v45 = vld [vmem:[#allocation3 + $0x64] ss:$8 sps:$4 sm:$0xff]   ;;  %v1871_v46 = vld [vmem:[#allocation3 + $0x60] ss:$8 sps:$4 sm:$0xff]  }
  0x5d   : > { %418 = vmatprep.subr.bf16.mxu0 %v1839_v9  ;;  %v601_v39 = vsel %vm598_vm1, %v599_v37, %v600_v32  ;;  %v1876_v47 = vld [vmem:[#allocation3 + $0x74] ss:$8 sps:$4 sm:$0xff]   ;;  %v1874_v48 = vld [vmem:[#allocation3 + $0x70] ss:$8 sps:$4 sm:$0xff]   ;;  %v1879_v49 = vld [vmem:[#allocation3 + $0x104] ss:$8 sps:$4 sm:$0xff]  }
  0x5e   : > { %v328_v29 = vsel %vm316_vm0, %v323_v25, %v327_v26  ;;  %v1877_v50 = vld [vmem:[#allocation3 + $0x100] ss:$8 sps:$4 sm:$0xff]   ;;  %v1882_v51 = vld [vmem:[#allocation3 + $0x114] ss:$8 sps:$4 sm:$0xff]   ;;  %v1880_v52 = vld [vmem:[#allocation3 + $0x110] ss:$8 sps:$4 sm:$0xff]   ;;  %v732_v26 = vlaneseq }
  0x5f   : > { %v1885_v53 = vld [vmem:[#allocation3 + $0x124] ss:$8 sps:$4 sm:$0xff]   ;;  %v1883_v54 = vld [vmem:[#allocation3 + $0x120] ss:$8 sps:$4 sm:$0xff]   ;;  %v1888_v55 = vld [vmem:[#allocation3 + $0x134] ss:$8 sps:$4 sm:$0xff]  }
  0x60   : > { %419 = vmatpush1.bf16.msra.mxu0 %v1841_v12  ;;  %v1886_v56 = vld [vmem:[#allocation3 + $0x130] ss:$8 sps:$4 sm:$0xff]   ;;  %v1891_v57 = vld [vmem:[#allocation3 + $0x144] ss:$8 sps:$4 sm:$0xff]   ;;  %v1889_v58 = vld [vmem:[#allocation3 + $0x140] ss:$8 sps:$4 sm:$0xff]  }
  0x61   : > { %420 = vmatprep.subr.bf16.mxu0 %v1842_v14  ;;  %v1894_v59 = vld [vmem:[#allocation3 + $0x154] ss:$8 sps:$4 sm:$0xff]   ;;  %v1892_v60 = vld [vmem:[#allocation3 + $0x150] ss:$8 sps:$4 sm:$0xff]   ;;  %v1897_v61 = vld [vmem:[#allocation3 + $0x164] ss:$8 sps:$4 sm:$0xff]  }
  0x62   : > { %v1895_v62 = vld [vmem:[#allocation3 + $0x160] ss:$8 sps:$4 sm:$0xff]   ;;  %v1900_v63 = vld [vmem:[#allocation3 + $0x174] ss:$8 sps:$4 sm:$0xff]   ;;  %vm255_vm3 = vsmask.f32 256 }
  0x63   : > { %v1902_v1 = vld [vmem:[#allocation6 + $0xc0] sm:$0xff]   ;;  %vm258_vm5 = vsmask.f32 4352  ;;  %vm2269_vm6 = vmand %vm254_vm2, %vm255_vm3  ;;  %v261_v4 = vld [vmem:[#allocation2] sm:$0x11]  ;;  %s1546_s15 = sshll.u32 %s245_s14, 7 }
  0x64   : > { %421 = vmatpush1.bf16.msra.mxu0 %v1844_v15  ;;  %v1903_v2 = vld [vmem:[#allocation6 + $0x80] sm:$0xff]   ;;  %1678 = vmatprep.subr.bf16.mxu1 %v1902_v1  ;;  %vm264_vm7 = vsmask.f32 7938  ;;  %vm2274_vm8 = vmand %vm257_vm4, %vm258_vm5  ;;  %vm266_vm9 = vsmask.f32 7954  ;;  %v1904_v6 = vld [vmem:[#allocation6 + $0xc8] sm:$0xff]  }
  0x65   : > { %422 = vmatprep.subr.bf16.mxu0 %v1845_v18  ;;  %1679 = vmatpush3.bf16.msra.mxu1 %v1903_v2  ;;  %vm260_vm10 = vmor %vm2274_vm8, %vm2269_vm6  ;;  %v1905_v7 = vld [vmem:[#allocation6 + $0x88] sm:$0xff]   ;;  %v269_v9 = vld [vmem:[#allocation2 + $0x10] sm:$0x11]  ;;  %s2337_s7 = scalar_lea.vmem [#allocation8], %s1546_s15  ;;  %s2087_s23 = smov 96  }
  0x66   : > { %v262_v8 = vsel %vm260_vm10, 0, %v261_v4  ;;  %vm265_vm11 = vmand %vm254_vm2, %vm264_vm7  ;;  %1680 = vmatprep.subr.bf16.mxu1 %v1904_v6  ;;  %v1906_v10 = vld [vmem:[#allocation6 + $0xd0] sm:$0xff]   ;;  %v1909_v14 = vld [vmem:[#allocation6 + $0x98] sm:$0xff]   ;;  %s2088_s25 = smov 112   ;;  %s2089_s26 = smov 80  }
  0x67   : > { %263 = vst [vmem:[#allocation2] sm:$0x11] %v262_v8  ;;  %vm267_vm12 = vmand %vm257_vm4, %vm266_vm9  ;;  %v1907_v11 = vld [vmem:[#allocation6 + $0x90] sm:$0xff]   ;;  %v1910_v17 = vld [vmem:[#allocation6 + $0xe0] sm:$0xff]   ;;  %s2090_s6 = smov 64   ;;  %s2091_s30 = smov 48  }
  0x68   : > { %423 = vmatpush1.bf16.msra.mxu0 %v1847_v19  ;;  %vm268_vm13 = vmor %vm267_vm12, %vm265_vm11  ;;  %v1911_v18 = vld [vmem:[#allocation6 + $0xa0] sm:$0xff]   ;;  %v1912_v19 = vld [vmem:[#allocation6 + $0xe8] sm:$0xff]   ;;  %s2092_s8 = smov 32   ;;  %s2093_s10 = smov 16  }
  0x69   : > { %424 = vmatprep.subr.bf16.mxu0 %v1848_v23  ;;  %1681 = vmatpush3.bf16.msra.mxu1 %v1905_v7  ;;  %v270_v12 = vsel %vm268_vm13, 0, %v269_v9  ;;  %vm2291_vm2 = vmand %vm782_vm14, %vm264_vm7  ;;  %v1913_v20 = vld [vmem:[#allocation6 + $0xa8] sm:$0xff]   ;;  %v1914_v21 = vld [vmem:[#allocation6 + $0xf0] sm:$0xff]   ;;  %vm760_vm7 = vsmask.f32 4368  ;;  %s1677_s9 = sshll.u32 %s2148_s22, 11 }
  0x6a   : > { %1682 = vmatprep.subr.bf16.mxu1 %v1906_v10  ;;  %271 = vst [vmem:[#allocation2 + $0x10] sm:$0x11] %v270_v12  ;;  %vm2296_vm5 = vmand %vm784_vm15, %vm266_vm9  ;;  %v1915_v22 = vld [vmem:[#allocation6 + $0xb0] sm:$0xff]   ;;  %v1916_v23 = vld [vmem:[#allocation6 + $0xf8] sm:$0xff]   ;;  %s1454_s11 = sshll.u32 %s2337_s7, 4  ;;  %s2372_s15 = scalar_lea.hbm %s2428_s5, %s1677_s9  ;;  %s2374_s11 = int_to_ptr.vmem [resolvable:$true] %s1454_s11 }
  0x6b   : > { %vm786_vm4 = vmor %vm2296_vm5, %vm2291_vm2  ;;  %v1919_v25 = vld [vmem:[#allocation6 + $0x40] sm:$0xff]   ;;  %s2382_s22 = scalar_lea.sflag [#allocation5], %s245_s14  ;;  %s2008_s16 = scalar_lea.vmem %s2374_s11, 2048 }
  0x6c   : > { %425 = vmatpush1.bf16.msra.mxu0 %v1850_v24  ;;  %v1917_v24 = vld [vmem:[#allocation6 + $0xb8] sm:$0xff]   ;;  %vm761_vm9 = vmor %vm255_vm3, %vm760_vm7  ;;  %p2009_p10 = scmp.ne.s32.totalorder %s2374_s11, %s2008_s16  ;;  %p2449_p1 = scmp.ne.s32.totalorder %s2432_s28, 0 }
  0x6d   : > { %534 = vmatprep.subr.bf16.mxu0 %v1853_v27  ;;  %1683 = vmatpush3.bf16.msra.mxu1 %v1907_v11  ;;  %v733_v27 = vshrl.u32 %v732_v26, 7  ;;  %v1925_v26 = vld [vmem:[#allocation6 + $0x10] sm:$0xff]   ;;  %s2094_s17 = smov [#allocation8]  }
  0x6e   : > { %p2010_p2 = pnand %p2009_p10, %p2449_p1 }
  0x6f   : > { %443 = vmatmul.mubr.bf16.vlgmr.msra.gmra.mrb[0].mxu0 %v328_v29  ;;  %v730_v29 = vld [vmem:[%s2425_s2] sm:$0x3] }
  0x70   : > { %535 = vmatpush1.bf16.msra.mxu0 %v1851_v28  ;;  %566 = vmatprep.mubr.bf16.mxu0 %v2086_v0  ;;  %v734_v28 = vsub.s32 0, %v733_v27  ;;  %p2011_p3 = pneg %p2010_p2 }
  0x71   : > { %536 = vmatprep.subr.bf16.mxu0 %v1858_v30  ;;  %v738_v30 = vsub.s32 1, %v733_v27  ;;  %v1926_v27 = vld [vmem:[#allocation6 + $0x58] sm:$0xff]  }
  0x73   : > { %v739_v32 = vrot.slane %v730_v29, %v738_v30  ;;  %v1929_v30 = vld [vmem:[#allocation6 + $0x20] sm:$0xff]  }
  0x74   : > { %537 = vmatpush1.bf16.msra.mxu0 %v1856_v31  ;;  %v735_v31 = vrot.slane %v730_v29, %v734_v28  ;;  %v1927_v28 = vld [vmem:[#allocation6 + $0x18] sm:$0xff]   ;;  %v1928_v29 = vld [vmem:[#allocation6 + $0x60] sm:$0xff]  }
  0x75   : > { %538 = vmatprep.subr.bf16.mxu0 %v1861_v33 }
  0x78   : > { %539 = vmatpush1.bf16.msra.mxu0 %v1859_v36 }
  0x79   : > { %540 = vmatprep.subr.bf16.mxu0 %v1864_v38 }
  0x7c   : > { %541 = vmatpush1.bf16.msra.mxu0 %v1862_v40 }
  0x7d   : > { %542 = vmatprep.subr.bf16.mxu0 %v1867_v41 }
  0x80   : > { %543 = vmatpush1.bf16.msra.mxu0 %v1865_v42 }
  0x81   : > { %544 = vmatprep.subr.bf16.mxu0 %v1870_v43 }
  0x84   : > { %545 = vmatpush1.bf16.msra.mxu0 %v1868_v44 }
  0x85   : > { %546 = vmatprep.subr.bf16.mxu0 %v1873_v45 }
  0x88   : > { %547 = vmatpush1.bf16.msra.mxu0 %v1871_v46 }
  0x89   : > { %548 = vmatprep.subr.bf16.mxu0 %v1876_v47 }
  0x8c   : > { %549 = vmatpush1.bf16.msra.mxu0 %v1874_v48 }
  0x8d   : > { %683 = vmatprep.subr.bf16.mxu0 %v1879_v49 }
  0x8f   : > { %567 = vmatmul.mubr.bf16.vlgmr.msra.gmra.mrb[0].mxu0 %v2257_v13  ;;  %v1908_v13 = vld [vmem:[#allocation6 + $0xd8] sm:$0xff]  }
  0x90   : > { %684 = vmatpush1.bf16.msra.mxu0 %v1877_v50  ;;  %715 = vmatprep.mubr.bf16.mxu0 %v2086_v0  ;;  %v1898_v0 = vld [vmem:[#allocation3 + $0x170] ss:$8 sps:$4 sm:$0xff]  }
  0x91   : > { %685 = vmatprep.subr.bf16.mxu0 %v1882_v51  ;;  %1684 = vmatprep.subr.bf16.mxu1 %v1908_v13  ;;  %v787_v51 = vld [vmem:[#allocation2] sm:$0xff] }
  0x92   : > { %1685 = vmatpush3.bf16.msra.mxu1 %v1909_v14 }
  0x93   : > { %1686 = vmatprep.subr.bf16.mxu1 %v1910_v17 }
  0x94   : > { %686 = vmatpush1.bf16.msra.mxu0 %v1880_v52 }
  0x95   : > { %687 = vmatprep.subr.bf16.mxu0 %v1885_v53 }
  0x96   : > { %1687 = vmatpush3.bf16.msra.mxu1 %v1911_v18 }
  0x97   : > { %1688 = vmatprep.subr.bf16.mxu1 %v1912_v19 }
  0x98   : > { %688 = vmatpush1.bf16.msra.mxu0 %v1883_v54 }
  0x99   : > { %689 = vmatprep.subr.bf16.mxu0 %v1888_v55  ;;  %v791_v55 = vld [vmem:[#allocation2 + $0x10] sm:$0x11] }
  0x9a   : > { %1689 = vmatpush3.bf16.msra.mxu1 %v1913_v20  ;;  %v1921_v20 = vld [vmem:[#allocation6] sm:$0xff]  }
  0x9b   : > { %1690 = vmatprep.subr.bf16.mxu1 %v1914_v21 }
  0x9c   : > { %690 = vmatpush1.bf16.msra.mxu0 %v1886_v56 }
  0x9d   : > { %691 = vmatprep.subr.bf16.mxu0 %v1891_v57 }
  0x9e   : > { %1691 = vmatpush3.bf16.msra.mxu1 %v1915_v22 }
  0x9f   : > { %1692 = vmatprep.subr.bf16.mxu1 %v1916_v23  ;;  %v1922_v23 = vld [vmem:[#allocation6 + $0x48] sm:$0xff]  }
  0xa0   : > { %692 = vmatpush1.bf16.msra.mxu0 %v1889_v58 }
  0xa1   : > { %693 = vmatprep.subr.bf16.mxu0 %v1894_v59 }
  0xa2   : > { %1693 = vmatpush3.bf16.msra.mxu1 %v1917_v24  ;;  %v1923_v24 = vld [vmem:[#allocation6 + $0x8] sm:$0xff]  }
  0xa3   : > { %1700 = vmatprep.subr.bf16.mxu1 %v1919_v25  ;;  %v1924_v25 = vld [vmem:[#allocation6 + $0x50] sm:$0xff]  }
  0xa4   : > { %694 = vmatpush1.bf16.msra.mxu0 %v1892_v60 }
  0xa5   : > { %695 = vmatprep.subr.bf16.mxu0 %v1897_v61 }
  0xa8   : > { %696 = vmatpush1.bf16.msra.mxu0 %v1895_v62 }
  0xa9   : > { %697 = vmatprep.subr.bf16.mxu0 %v1900_v63 }
  0xac   : > { %698 = vmatpush1.bf16.msra.mxu0 %v1898_v0 }
  0xaf   : > { %716 = vmatmul.mubr.bf16.vlgmr.msra.gmra.mrb[0].mxu0 %v601_v39 }
 0x182   : > { %v717_v33 = vpop.f32.mrb[0].mxu0 }
 0x183   : > { %v742_v34 = vadd.f32 %v735_v31, %v717_v33  ;;  %v719_v35 = vpop.f32.mrb[1].mxu0  ;;  %v1932_v33 = vld [vmem:[#allocation6 + $0x70] sm:$0xff]  }
 0x184   : > { %v743_v36 = vadd.f32 %v739_v32, %v719_v35  ;;  %v721_v37 = vpop.f32.mrb[2].mxu0  ;;  %v1934_v35 = vld [vmem:[#allocation6 + $0x78] sm:$0xff]  }
 0x185   : > { %v746_v38 = vmax.f32 %v742_v34, 0.0  ;;  %v744_v39 = vadd.f32 %v735_v31, %v721_v37  ;;  %v723_v40 = vpop.f32.mrb[3].mxu0  ;;  %v1930_v31 = vld [vmem:[#allocation6 + $0x68] sm:$0xff]   ;;  %v1933_v34 = vld [vmem:[#allocation6 + $0x30] sm:$0xff]   ;;  %v1936_v37 = vld [vmem:[#allocation6 + $0x140] sm:$0xff]  }
 0x186   : > { %v747_v41 = vmax.f32 %v743_v36, 0.0  ;;  %v745_v42 = vadd.f32 %v739_v32, %v723_v40  ;;  %v1931_v32 = vld [vmem:[#allocation6 + $0x28] sm:$0xff]   ;;  %v1935_v36 = vld [vmem:[#allocation6 + $0x38] sm:$0xff]   ;;  %v1937_v40 = vld [vmem:[#allocation6 + $0x100] sm:$0xff]  }
 0x187   : > { %v748_v43 = vmax.f32 %v744_v39, 0.0 }
 0x188   : > { %v1675_v44 = vpack.c.bf16 %v747_v41, %v746_v38  ;;  %v749_v45 = vmax.f32 %v745_v42, 0.0  ;;  %v1938_v42 = vld [vmem:[#allocation6 + $0x148] sm:$0xff]  }
 0x18a   : > { %v763_v46 = vshrl.u32 %v1675_v44, 16  ;;  %v1676_v47 = vpack.c.bf16 %v749_v45, %v748_v43  ;;  %v766_v49 = vshll.u32 %v1675_v44, 16  ;;  %v1939_v44 = vld [vmem:[#allocation6 + $0x108] sm:$0xff]   ;;  %v1940_v45 = vld [vmem:[#allocation6 + $0x150] sm:$0xff]  }
 0x18c   : > { %v765_v48 = vrot.slane %v763_v46, 7  ;;  %v771_v50 = vshrl.u32 %v1676_v47, 16  ;;  %v774_v54 = vshll.u32 %v1676_v47, 16  ;;  %v1941_v46 = vld [vmem:[#allocation6 + $0x110] sm:$0xff]   ;;  %v1942_v47 = vld [vmem:[#allocation6 + $0x158] sm:$0xff]  }
 0x18e   : > { %v768_v52 = vor.u32 %v766_v49, %v765_v48  ;;  %v773_v53 = vrot.slane %v771_v50, 7  ;;  %v769_v56 = vrot.slane %v765_v48, 4  ;;  %v1943_v48 = vld [vmem:[#allocation6 + $0x118] sm:$0xff]   ;;  %v1944_v49 = vld [vmem:[#allocation6 + $0x160] sm:$0xff]  }
 0x18f   : > { %v1945_v50 = vld [vmem:[#allocation6 + $0x120] sm:$0xff]  }
 0x190   : > { %v788_v57 = vsel %vm786_vm4, %v768_v52, %v787_v51  ;;  %v776_v58 = vor.u32 %v774_v54, %v773_v53  ;;  %v778_v59 = vrot.slane %v773_v53, 4  ;;  %v1946_v51 = vld [vmem:[#allocation6 + $0x168] sm:$0xff]   ;;  %v1948_v53 = vld [vmem:[#allocation6 + $0x170] sm:$0xff]  }
 0x191   : > { %789 = vst [vmem:[#allocation2] sm:$0xff] %v788_v57  ;;  %v1947_v52 = vld [vmem:[#allocation6 + $0x128] sm:$0xff]   ;;  %v1949_v54 = vld [vmem:[#allocation6 + $0x130] sm:$0xff]  }
 0x192   : > { %v2313_v60 = vsel %vm761_vm9, %v769_v56, %v776_v58  ;;  %v792_v61 = vsel %vm260_vm10, %v778_v59, %v791_v55  ;;  %v1950_v55 = vld [vmem:[#allocation6 + $0x178] sm:$0xff]  }
 0x193   : > { %793 = vst [vmem:[#allocation2 + $0x10] sm:$0x11] %v792_v61  ;;  %v1602_v62 = vcombine.high %v788_v57, %v2313_v60  ;;  %v1601_v63 = vcombine.low %v788_v57, %v2313_v60  ;;  %v1951_v56 = vld [vmem:[#allocation6 + $0x138] sm:$0xff]  }
 0x195   : > { %v890_v0 = vshll.u32 %v1602_v62, 16  ;;  %v878_v1 = vshll.u32 %v1601_v63, 16  ;;  %v888_v5 = vshrl.u32 %v1602_v62, 16  ;;  %v876_v11 = vshrl.u32 %v1601_v63, 16 }
 0x197   : > { %v892_v7 = vrot.slane %v890_v0, 1  ;;  %v880_v10 = vrot.slane %v878_v1, 1 }
 0x198   : > { %v1177_v2 = vld [vmem:[#allocation2] sm:$0xee] }
 0x199   : > { %v1637_v4 = vcombine.low %v1177_v2, %v2313_v60  ;;  %v893_v15 = vor.u32 %v892_v7, %v888_v5  ;;  %v881_v17 = vor.u32 %v880_v10, %v876_v11  ;;  %v1638_v38 = vcombine.high %v1177_v2, %v2313_v60 }
 0x19a   : > { %v828_v6 = vld [vmem:[#allocation2 + $0x10] sm:$0x11] }
 0x19b   : > { %v1604_v8 = vcombine.high %v828_v6, %v828_v6  ;;  %v1603_v9 = vcombine.low %v828_v6, %v828_v6  ;;  %v1216_v13 = vrot.slane %v1637_v4, 1  ;;  %v1219_v41 = vrot.slane %v1638_v38, 1 }
 0x19d   : > { %v895_v3 = vshll.u32 %v1604_v8, 16  ;;  %v883_v12 = vshll.u32 %v1603_v9, 16  ;;  %v1217_v14 = vrot.slane %v1603_v9, 1  ;;  %v1220_v39 = vrot.slane %v1604_v8, 1 }
 0x19f   : > { %v897_v16 = vrot.slane %v895_v3, 1  ;;  %v885_v18 = vrot.slane %v883_v12, 1  ;;  %v2324_v19 = vsel %vm598_vm1, %v1216_v13, %v1217_v14  ;;  %v1221_v43 = vsel %vm598_vm1, %v1219_v41, %v1220_v39  ;;  %v1655_v3 = vld [vmem:[%s2427_s4] ss:$0 sm:$0xff] }
 0x1a1   : > { %v898_v21 = vsel %vm316_vm0, %v893_v15, %v897_v16  ;;  %v886_v22 = vsel %vm316_vm0, %v881_v17, %v885_v18  ;;  %vm1372_vm0 = vcmask 130048  }
 0x1a2   : > { %1029 = vmatprep.mubr.bf16.mxu1 %v898_v21 }
 0x1a3   : > { %1030 = vmatmul.mubr.bf16.vlgmr.msra.gmra.mrb[0].mxu1 %v886_v22 }
 0x1a4   : > { %1701 = vmatpush3.bf16.msra.mxu1 %v1921_v20  ;;  %1168 = vmatprep.mubr.bf16.mxu1 %v1602_v62 }
 0x1a5   : > { %1702 = vmatprep.subr.bf16.mxu1 %v1922_v23 }
 0x1a8   : > { %1703 = vmatpush3.bf16.msra.mxu1 %v1923_v24 }
 0x1a9   : > { %1704 = vmatprep.subr.bf16.mxu1 %v1924_v25 }
 0x1ac   : > { %1705 = vmatpush3.bf16.msra.mxu1 %v1925_v26 }
 0x1ad   : > { %1706 = vmatprep.subr.bf16.mxu1 %v1926_v27 }
 0x1b0   : > { %1707 = vmatpush3.bf16.msra.mxu1 %v1927_v28 }
 0x1b1   : > { %1708 = vmatprep.subr.bf16.mxu1 %v1928_v29 }
 0x1b4   : > { %1709 = vmatpush3.bf16.msra.mxu1 %v1929_v30 }
 0x1b5   : > { %1710 = vmatprep.subr.bf16.mxu1 %v1930_v31 }
 0x1b8   : > { %1711 = vmatpush3.bf16.msra.mxu1 %v1931_v32 }
 0x1b9   : > { %1712 = vmatprep.subr.bf16.mxu1 %v1932_v33 }
 0x1bc   : > { %1713 = vmatpush3.bf16.msra.mxu1 %v1933_v34 }
 0x1bd   : > { %1714 = vmatprep.subr.bf16.mxu1 %v1934_v35 }
 0x1c0   : > { %1715 = vmatpush3.bf16.msra.mxu1 %v1935_v36 }
 0x1c1   : > { %1722 = vmatprep.subr.bf16.mxu1 %v1936_v37 }
 0x1c3   : > { %1169 = vmatmul.mubr.bf16.vlgmr.msra.gmra.mrb[4].mxu1 %v1601_v63 }
 0x1c4   : > { %1723 = vmatpush3.bf16.msra.mxu1 %v1937_v40  ;;  %1352 = vmatprep.mubr.bf16.mxu1 %v1221_v43 }
 0x1c5   : > { %1724 = vmatprep.subr.bf16.mxu1 %v1938_v42 }
 0x1c8   : > { %1725 = vmatpush3.bf16.msra.mxu1 %v1939_v44 }
 0x1c9   : > { %1726 = vmatprep.subr.bf16.mxu1 %v1940_v45 }
 0x1cc   : > { %1727 = vmatpush3.bf16.msra.mxu1 %v1941_v46 }
 0x1cd   : > { %1728 = vmatprep.subr.bf16.mxu1 %v1942_v47 }
 0x1d0   : > { %1729 = vmatpush3.bf16.msra.mxu1 %v1943_v48 }
 0x1d1   : > { %1730 = vmatprep.subr.bf16.mxu1 %v1944_v49 }
 0x1d4   : > { %1731 = vmatpush3.bf16.msra.mxu1 %v1945_v50 }
 0x1d5   : > { %1732 = vmatprep.subr.bf16.mxu1 %v1946_v51 }
 0x1d8   : > { %1733 = vmatpush3.bf16.msra.mxu1 %v1947_v52 }
 0x1d9   : > { %1734 = vmatprep.subr.bf16.mxu1 %v1948_v53 }
 0x1dc   : > { %1735 = vmatpush3.bf16.msra.mxu1 %v1949_v54 }
 0x1dd   : > { %1736 = vmatprep.subr.bf16.mxu1 %v1950_v55 }
 0x1e0   : > { %1737 = vmatpush3.bf16.msra.mxu1 %v1951_v56 }
 0x1e3   : > { %1353 = vmatmul.mubr.bf16.vlgmr.msra.gmra.mrb[8].mxu1 %v2324_v19 }
 0x276   : > { %v1694_v57 = vpop.f32.mrb[0].mxu1 }
 0x277   : > { %v1695_v58 = vpop.f32.mrb[1].mxu1 }
 0x278   : > { %v1696_v59 = vadd.f32 %v1695_v58, %v1694_v57  ;;  %v1697_v60 = vpop.f32.mrb[2].mxu1 }
 0x279   : > { %v1698_v61 = vpop.f32.mrb[3].mxu1 }
 0x27a   : > { %v1699_v62 = vadd.f32 %v1698_v61, %v1697_v60 }
 0x296   : > { %v1716_v63 = vpop.f32.mrb[4].mxu1 }
 0x297   : > { %v1717_v0 = vpop.f32.mrb[5].mxu1 }
 0x298   : > { %v1718_v1 = vadd.f32 %v1717_v0, %v1716_v63  ;;  %v1719_v2 = vpop.f32.mrb[6].mxu1 }
 0x299   : > { %v1720_v4 = vpop.f32.mrb[7].mxu1 }
 0x29a   : > { %v1171_v6 = vadd.f32 %v1718_v1, %v1696_v59  ;;  %v1721_v7 = vadd.f32 %v1720_v4, %v1719_v2 }
 0x29c   : > { %v1174_v8 = vadd.f32 %v1721_v7, %v1699_v62 }
 0x2b6   : > { %v1738_v9 = vpop.f32.mrb[8].mxu1 }
 0x2b7   : > { %v1739_v10 = vpop.f32.mrb[9].mxu1 }
 0x2b8   : > { %v1740_v5 = vadd.f32 %v1739_v10, %v1738_v9  ;;  %v1741_v11 = vpop.f32.mrb[10].mxu1 }
 0x2b9   : > { %v1742_v12 = vpop.f32.mrb[11].mxu1 }
 0x2ba   : > { %v1361_v13 = vadd.f32 %v1740_v5, %v1171_v6  ;;  %v1743_v14 = vadd.f32 %v1742_v12, %v1741_v11 }
 0x2bc   : > { %v1370_v15 = vadd.f32 %v1655_v3, %v1361_v13  ;;  %v1362_v16 = vadd.f32 %v1743_v14, %v1174_v8 }
 0x2be   : > { %1373 = vst.msk [vmem:[%s2337_s7] sm:$0xff] %vm1372_vm0, %v1370_v15  ;;  %v1371_v17 = vadd.f32 %v1655_v3, %v1362_v16  ;;  %1386 = vrot.lane.b32.xlu1 %v1370_v15, %s2087_s23  ;;  %1377 = vrot.lane.b32.xlu0 %v1370_v15, %s2088_s25 }
 0x2c0   : > { %1374 = vst.msk [vmem:[%s2337_s7 + $0x8] sm:$0xff] %vm1372_vm0, %v1371_v17 }
 0x2c2   : > { %1388 = vrot.lane.b32.xlu1 %v1371_v17, %s2087_s23  ;;  %1395 = vrot.lane.b32.xlu0 %v1370_v15, %s2089_s26  ;;  %s2012_s23 = sshll.u32 %s2094_s17, 4  ;;  %s2013_s23 = int_to_ptr.vmem [resolvable:$false] %s2012_s23 }
 0x2c3   : > { %p2015_p4 = scmp.lt.s32.totalorder %s2374_s11, %s2013_s23 }
 0x2c6   : > { %1397 = vrot.lane.b32.xlu1 %v1371_v17, %s2089_s26  ;;  %1404 = vrot.lane.b32.xlu0 %v1370_v15, %s2090_s6 }
 0x2ca   : > { %1406 = vrot.lane.b32.xlu1 %v1371_v17, %s2090_s6  ;;  %1413 = vrot.lane.b32.xlu0 %v1370_v15, %s2091_s30 }
 0x2ce   : > { %1415 = vrot.lane.b32.xlu1 %v1371_v17, %s2091_s30  ;;  %1422 = vrot.lane.b32.xlu0 %v1370_v15, %s2092_s8 }
 0x2d2   : > { %1424 = vrot.lane.b32.xlu1 %v1371_v17, %s2092_s8  ;;  %1379 = vrot.lane.b32.xlu0 %v1371_v17, %s2088_s25  ;;  %s2014_s25 = scalar_lea.vmem %s2013_s23, 4096 }
 0x2d3   : > { %p2016_p7 = scmp.lt.s32.totalorder %s2014_s25, %s2008_s16 }
 0x2d5   : > { %p2017_p8 = por %p2016_p7, %p2015_p4 }
 0x2d6   : > { %1433 = vrot.lane.b32.xlu1 %v1371_v17, %s2093_s10  ;;  %1431 = vrot.lane.b32.xlu0 %v1370_v15, %s2093_s10 }
 0x2d7   : > { %p2018_p11 = pnand %p2017_p8, %p2011_p3 }
 0x330   : > { %v1387_v18 = vpop.permute.xlu1 %1386  ;;  %v1378_v19 = vpop.permute.xlu0 %1377 }
 0x331   : > { %1658 = vst.msk [vmem:[%s2337_s7 + $0x20] sm:$0xff] %vm1372_vm0, %v1387_v18  ;;  %1656 = vst.msk [vmem:[%s2337_s7 + $0x10] sm:$0xff] %vm1372_vm0, %v1378_v19 }
 0x334   : > { %v1389_v20 = vpop.permute.xlu1 %1388  ;;  %v1396_v21 = vpop.permute.xlu0 %1395 }
 0x335   : > { %1659 = vst.msk [vmem:[%s2337_s7 + $0x28] sm:$0xff] %vm1372_vm0, %v1389_v20  ;;  %1660 = vst.msk [vmem:[%s2337_s7 + $0x30] sm:$0xff] %vm1372_vm0, %v1396_v21 }
 0x338   : > { %v1398_v22 = vpop.permute.xlu1 %1397  ;;  %v1405_v23 = vpop.permute.xlu0 %1404 }
 0x339   : > { %1661 = vst.msk [vmem:[%s2337_s7 + $0x38] sm:$0xff] %vm1372_vm0, %v1398_v22  ;;  %1662 = vst.msk [vmem:[%s2337_s7 + $0x40] sm:$0xff] %vm1372_vm0, %v1405_v23 }
 0x33c   : > { %v1407_v24 = vpop.permute.xlu1 %1406  ;;  %v1414_v25 = vpop.permute.xlu0 %1413 }
 0x33d   : > { %1663 = vst.msk [vmem:[%s2337_s7 + $0x48] sm:$0xff] %vm1372_vm0, %v1407_v24  ;;  %1664 = vst.msk [vmem:[%s2337_s7 + $0x50] sm:$0xff] %vm1372_vm0, %v1414_v25 }
 0x340   : > { %v1416_v26 = vpop.permute.xlu1 %1415  ;;  %v1423_v27 = vpop.permute.xlu0 %1422 }
 0x341   : > { %1665 = vst.msk [vmem:[%s2337_s7 + $0x58] sm:$0xff] %vm1372_vm0, %v1416_v26  ;;  %1666 = vst.msk [vmem:[%s2337_s7 + $0x60] sm:$0xff] %vm1372_vm0, %v1423_v27 }
 0x344   : > { %v1425_v28 = vpop.permute.xlu1 %1424  ;;  %v1380_v29 = vpop.permute.xlu0 %1379 }
 0x345   : > { %1667 = vst.msk [vmem:[%s2337_s7 + $0x68] sm:$0xff] %vm1372_vm0, %v1425_v28  ;;  %1657 = vst.msk [vmem:[%s2337_s7 + $0x18] sm:$0xff] %vm1372_vm0, %v1380_v29 }
 0x348   : > { %v1434_v30 = vpop.permute.xlu1 %1433  ;;  %v1432_v31 = vpop.permute.xlu0 %1431 }
 0x349   : > { %1669 = vst.msk [vmem:[%s2337_s7 + $0x78] sm:$0xff] %vm1372_vm0, %v1434_v30  ;;  %1668 = vst.msk [vmem:[%s2337_s7 + $0x70] sm:$0xff] %vm1372_vm0, %v1432_v31 }
 0x34a   : > { %2021 = shalt.err (!%p2018_p11)
}
 0x34b   : > { %s2022_s14 = scalar_lea.hbm %s2372_s15, 2048  ;;  %s2026_s6 = scalar_lea.hbm %s2428_s5, 4096 }
 0x34c   : > { %p2023_p13 = scmp.ne.s32.totalorder %s2372_s15, %s2022_s14  ;;  %p2027_p6 = scmp.lt.u32.totalorder %s2372_s15, %s2428_s5 }
 0x34d   : > { %p2028_p9 = scmp.lt.u32.totalorder %s2026_s6, %s2022_s14  ;;  %p2030_p10 = scmp.lt.u32.totalorder %s2022_s14, %s2372_s15 }
 0x34e   : > { %p2024_p0 = pnand %p2023_p13, %p2449_p1 }
 0x34f   : > { %p2029_p12 = por %p2028_p9, %p2027_p6 }
 0x350   : > { %p2025_p5 = pneg %p2024_p0 }
 0x351   : > { %p2031_p2 = por %p2030_p10, %p2029_p12 }
 0x353   : > { %p2032_p3 = pnand %p2031_p2, %p2025_p5 }
 0x355   : > { %2035 = shalt.err (!%p2032_p3)
}
 0x356   : > { %s2095_s10 = smov 128   ;;  %s2096_s9 = smov 8  }
 0x357   : > { %1761 = dma.vmem_to_hbm [thread:$0]  (%p2449_p1), %s2374_s11, 2048, %s2372_s15, %s2382_s22, %s2095_s10, %s2095_s10, %s2096_s9  }
 0x358 PF: > { %p1778_p4 = scmp.ge.s32.totalorder %s2078_s21, 2  ;;  %s1469_s12 = sand.u32 1, %s2066_s18  }
 0x359   : > { %p2450_p7 = scmp.ne.s32.totalorder %s2433_s29, 0  ;;  %s1470_s13 = scalar_lea.sflag [#allocation5], %s1469_s12 }
 0x35b   : > { %p1771_p8 = pnand %p1778_p4, %p2450_p7 }
 0x35d   : > { %2061 = dma.done.wait (!%p1771_p8), %s1470_s13, 2048  }
 0x35e   : > { %2063 = vsyncadd (!%p1771_p8), %s1470_s13, 4294965248  ;;  %p17_p11 = scmp.ge.s32.totalorder %s2152_s24, 4   ;;  %s2451_s18 = smov %s2070_s19 }
 0x35f   : > { %s2452_s19 = smov %s2074_s20  ;;  %s2453_s20 = smov %s2163_s27 }
 0x360   : > { %s2454_s21 = smov %s2152_s24  ;;  %19 = sbr.rel (!%p17_p11) target bundleno = 5 (0x5), region = 95 }
 0x367   :  { %1475 = vsyncpa [#allocation4], 1 }
 0x368   :  { %1477 = vsyncpa [#allocation4 + $0x1], 1 }
 0x369   :  { %1478 = vsyncpa [#allocation7], 1 }
 0x36a   :  { %1479 = vsyncpa [#allocation5], 1 }
 0x36b   :  { %1481 = vsyncpa [#allocation5 + $0x1], 1 }

</bundles_post_ra>
